<compile_context>
chip_gen: v6e
topology: v6e:2x2x1
jax: 0.10.0
libtpu: 0.0.40
codegen_flags: <defaults>
</compile_context>

<pallas_src>
import jax
import jax.numpy as jnp
from jax.experimental import pallas as pl
from jax.experimental.pallas import tpu as pltpu

IN_F = 13
H1 = 64
H2 = 32
OUT_F = 1


def _round_up(n, m):
    return (n + m - 1) // m * m


def saint_kernel(x_ref, w1_ref, b1_ref, w2_ref, b2_ref, w3_ref, b3_ref, out_ref):
    h = x_ref[...]                                                 # (bb, 13) f32
    h = jnp.maximum(
        jnp.dot(h, w1_ref[...], preferred_element_type=jnp.float32) + b1_ref[...],
        0.0)                                                       # (bb, 64) f32
    h = jnp.maximum(
        jnp.dot(h, w2_ref[...], preferred_element_type=jnp.float32) + b2_ref[...],
        0.0)                                                       # (bb, 32) f32
    # fc3 has a single output column: VPU multiply + cross-lane row reduction
    # avoids a lane-padded MXU matmul and keeps the output store 1-wide.
    out_ref[...] = (jnp.sum(h * w3_ref[...], axis=-1, keepdims=True)
                    + b3_ref[...]).astype(out_ref.dtype)           # (bb, 1)


def saint_forward(x, params, *, block_b=8192):
    """x: (B, 13) f32.  params: kernel-ready params from pack_params()."""
    w1, b1, w2, b2, w3, b3 = params
    B = x.shape[0]

    bb = min(block_b, _round_up(B, 8))          # batch tile (multiple of 8 sublanes)
    # Prefer >= 2 grid steps so the "parallel" batch axis can shard across
    # v7x's two TensorCores (harmless no-op on single-TC v5e/v6e).
    if B > 8 and _round_up(B, bb) // bb < 2:
        bb = _round_up(pl.cdiv(B, 2), 8)
    Bp = _round_up(B, bb)

    # Only pad the batch dim (rarely needed); no feature pad, no pre-cast.
    xp = x if Bp == B else jnp.zeros((Bp, IN_F), x.dtype).at[:B].set(x)

    def resident(shape):
        # Same block every grid step -> weights/biases stay VMEM-resident.
        return pl.BlockSpec(shape, lambda i: (0, 0))

    param_bytes = 4 * (IN_F * H1 + H1 + H1 * H2 + H2 + H2 * OUT_F + OUT_F)
    cost = pl.CostEstimate(
        flops=2 * Bp * (IN_F * H1 + H1 * H2 + H2 * OUT_F),
        transcendentals=0,
        bytes_accessed=Bp * (IN_F + OUT_F) * 4 + param_bytes,
    )

    out = pl.pallas_call(
        saint_kernel,
        out_shape=jax.ShapeDtypeStruct((Bp, OUT_F), jnp.float32),
        grid=(Bp // bb,),
        in_specs=[
            pl.BlockSpec((bb, IN_F), lambda i: (i, 0)),   # x batch tile, raw f32
            resident(w1.shape), resident(b1.shape),
            resident(w2.shape), resident(b2.shape),
            resident(w3.shape), resident(b3.shape),
        ],
        out_specs=pl.BlockSpec((bb, OUT_F), lambda i: (i, 0)),
        compiler_params=pltpu.CompilerParams(
            dimension_semantics=("parallel",)),
        cost_estimate=cost,
    )(xp, w1, b1, w2, b2, w3, b3)

    return out if Bp == B else out[:B]


def init_params(key):
    """PyTorch nn.Linear default init at the module's true shapes.

    nn.Linear(in, out) stores weight as (out, in); we generate that shape and
    transpose to (in, out) for the kernel's x @ W convention.
    """
    dims = [(IN_F, H1), (H1, H2), (H2, OUT_F)]
    raw = []
    for fan_in, fan_out in dims:
        key, kw, kb = jax.random.split(key, 3)
        bound = 1.0 / jnp.sqrt(jnp.float32(fan_in))
        w = jax.random.uniform(kw, (fan_out, fan_in), jnp.float32, -bound, bound)
        b = jax.random.uniform(kb, (fan_out,), jnp.float32, -bound, bound)
        raw.append((jnp.transpose(w), b))
    return raw


def pack_params(raw):
    """Kernel-ready params: f32 weights at true shapes, biases as rows,
    fc3 weight as a (1, 32) lane row for the VPU multiply + reduce."""
    (w1, b1), (w2, b2), (w3, b3) = raw
    return (
        w1, b1.reshape(1, H1),                 # (13, 64), (1, 64)
        w2, b2.reshape(1, H2),                 # (64, 32), (1, 32)
        w3.reshape(1, H2),                     # (1, 32)  fc3 weight row
        b3.reshape(1, OUT_F),                  # (1, 1)
    )


def reference_forward(x, raw):
    """Plain-JAX f32 reference matching the kernel's math."""
    (w1, b1), (w2, b2), (w3, b3) = raw
    h = jnp.maximum(jnp.dot(x, w1, preferred_element_type=jnp.float32) + b1, 0.0)
    h = jnp.maximum(jnp.dot(h, w2, preferred_element_type=jnp.float32) + b2, 0.0)
    return jnp.sum(h * w3.reshape(1, H2), axis=-1, keepdims=True) + b3


if __name__ == "__main__":
    key = jax.random.PRNGKey(0)
    key, kx = jax.random.split(key)

    batch = 32
    x = jax.random.normal(kx, (batch, IN_F), jnp.float32)

    raw = init_params(key)
    params = pack_params(raw)

    # Default block_b heuristic gives bb=16 -> 2 grid steps at this toy batch;
    # large batches get 4K-8K row tiles automatically.
    out = saint_forward(x, params)
    out = jax.block_until_ready(out)

    ref = reference_forward(x, raw)
    assert out.shape == (batch, OUT_F), out.shape
    assert jnp.allclose(out, ref, atol=2e-3, rtol=2e-3), (
        "mismatch vs reference, max abs err = "
        + str(float(jnp.max(jnp.abs(out - ref)))))

    print("KERNEL_OK")
</pallas_src>

<mosaic_0001>
module attributes {stable_mosaic.version = 11 : i64} {
  func.func @saint_kernel(%arg0: i32, %arg1: memref<16x13xf32, #tpu.memory_space<vmem>>, %arg2: memref<13x64xf32, #tpu.memory_space<vmem>>, %arg3: memref<1x64xf32, #tpu.memory_space<vmem>>, %arg4: memref<64x32xf32, #tpu.memory_space<vmem>>, %arg5: memref<1x32xf32, #tpu.memory_space<vmem>>, %arg6: memref<1x32xf32, #tpu.memory_space<vmem>>, %arg7: memref<1x1xf32, #tpu.memory_space<vmem>>, %arg8: memref<16x1xf32, #tpu.memory_space<vmem>>) attributes {dimension_semantics = [#tpu.dimension_semantics<parallel>], iteration_bounds = array<i64: 2>, scalar_prefetch = 0 : i64, scratch_operands = 0 : i64, tpu.core_type = #tpu.core_type<tc>, window_params = [{transform_indices = @transform_0, window_bounds = array<i64: 16, 13>}, {pipeline_mode = #tpu.pipeline_mode<synchronous>, transform_indices = @transform_1, window_bounds = array<i64: 13, 64>}, {pipeline_mode = #tpu.pipeline_mode<synchronous>, transform_indices = @transform_2, window_bounds = array<i64: 1, 64>}, {pipeline_mode = #tpu.pipeline_mode<synchronous>, transform_indices = @transform_3, window_bounds = array<i64: 64, 32>}, {pipeline_mode = #tpu.pipeline_mode<synchronous>, transform_indices = @transform_4, window_bounds = array<i64: 1, 32>}, {pipeline_mode = #tpu.pipeline_mode<synchronous>, transform_indices = @transform_5, window_bounds = array<i64: 1, 32>}, {pipeline_mode = #tpu.pipeline_mode<synchronous>, transform_indices = @transform_6, window_bounds = array<i64: 1, 1>}, {transform_indices = @transform_7, window_bounds = array<i64: 16, 1>}]} {
    %c0 = arith.constant 0 : index
    %c0_0 = arith.constant 0 : index
    %0 = vector.load %arg1[%c0, %c0_0] : memref<16x13xf32, #tpu.memory_space<vmem>>, vector<16x13xf32>
    %c0_1 = arith.constant 0 : index
    %c0_2 = arith.constant 0 : index
    %1 = vector.load %arg2[%c0_1, %c0_2] : memref<13x64xf32, #tpu.memory_space<vmem>>, vector<13x64xf32>
    %cst = arith.constant dense<0.000000e+00> : vector<16x64xf32>
    %2 = tpu.matmul %0, %1, %cst {dimension_numbers = #tpu.dot_dimension_numbers<[1], [0], [0], [1], [0, 0, 1, 1], [], []>} : vector<16x13xf32>, vector<13x64xf32>, vector<16x64xf32> -> vector<16x64xf32>
    %c0_3 = arith.constant 0 : index
    %c0_4 = arith.constant 0 : index
    %3 = vector.load %arg3[%c0_3, %c0_4] : memref<1x64xf32, #tpu.memory_space<vmem>>, vector<1x64xf32>
    %4 = vector.broadcast %3 : vector<1x64xf32> to vector<16x64xf32>
    %5 = arith.addf %2, %4 : vector<16x64xf32>
    %cst_5 = arith.constant 0.000000e+00 : f32
    %6 = vector.broadcast %cst_5 : f32 to vector<16x64xf32>
    %7 = arith.maximumf %5, %6 : vector<16x64xf32>
    %c0_6 = arith.constant 0 : index
    %c0_7 = arith.constant 0 : index
    %8 = vector.load %arg4[%c0_6, %c0_7] : memref<64x32xf32, #tpu.memory_space<vmem>>, vector<64x32xf32>
    %cst_8 = arith.constant dense<0.000000e+00> : vector<16x32xf32>
    %9 = tpu.matmul %7, %8, %cst_8 {dimension_numbers = #tpu.dot_dimension_numbers<[1], [0], [0], [1], [0, 0, 1, 1], [], []>} : vector<16x64xf32>, vector<64x32xf32>, vector<16x32xf32> -> vector<16x32xf32>
    %c0_9 = arith.constant 0 : index
    %c0_10 = arith.constant 0 : index
    %10 = vector.load %arg5[%c0_9, %c0_10] : memref<1x32xf32, #tpu.memory_space<vmem>>, vector<1x32xf32>
    %11 = vector.broadcast %10 : vector<1x32xf32> to vector<16x32xf32>
    %12 = arith.addf %9, %11 : vector<16x32xf32>
    %cst_11 = arith.constant 0.000000e+00 : f32
    %13 = vector.broadcast %cst_11 : f32 to vector<16x32xf32>
    %14 = arith.maximumf %12, %13 : vector<16x32xf32>
    %c0_12 = arith.constant 0 : index
    %c0_13 = arith.constant 0 : index
    %15 = vector.load %arg6[%c0_12, %c0_13] : memref<1x32xf32, #tpu.memory_space<vmem>>, vector<1x32xf32>
    %16 = vector.broadcast %15 : vector<1x32xf32> to vector<16x32xf32>
    %17 = arith.mulf %14, %16 : vector<16x32xf32>
    %cst_14 = arith.constant dense<0.000000e+00> : vector<16xf32>
    %18 = vector.multi_reduction <add>, %17, %cst_14 [1] : vector<16x32xf32> to vector<16xf32>
    %19 = vector.shape_cast %18 : vector<16xf32> to vector<16x1xf32>
    %c0_15 = arith.constant 0 : index
    %c0_16 = arith.constant 0 : index
    %20 = vector.load %arg7[%c0_15, %c0_16] : memref<1x1xf32, #tpu.memory_space<vmem>>, vector<1x1xf32>
    %21 = vector.broadcast %20 : vector<1x1xf32> to vector<16x1xf32>
    %22 = arith.addf %19, %21 : vector<16x1xf32>
    %c0_17 = arith.constant 0 : index
    %c0_18 = arith.constant 0 : index
    %23 = vector.load %arg8[%c0_17, %c0_18] : memref<16x1xf32, #tpu.memory_space<vmem>>, vector<16x1xf32>
    tpu.vector_store %arg8[%c0_17, %c0_18], %22 {strides = array<i32>} : memref<16x1xf32, #tpu.memory_space<vmem>>, vector<16x1xf32>,
    return
  }
  func.func @transform_0(%arg0: i32) -> (i32, i32) {
    %c0_i32 = arith.constant 0 : i32
    %c0_i32_0 = arith.constant 0 : i32
    return %arg0, %c0_i32 : i32, i32
  }
  func.func @transform_1(%arg0: i32) -> (i32, i32) {
    %c0_i32 = arith.constant 0 : i32
    %c0_i32_0 = arith.constant 0 : i32
    %c0_i32_1 = arith.constant 0 : i32
    return %c0_i32, %c0_i32_0 : i32, i32
  }
  func.func @transform_2(%arg0: i32) -> (i32, i32) {
    %c0_i32 = arith.constant 0 : i32
    %c0_i32_0 = arith.constant 0 : i32
    %c0_i32_1 = arith.constant 0 : i32
    return %c0_i32, %c0_i32_0 : i32, i32
  }
  func.func @transform_3(%arg0: i32) -> (i32, i32) {
    %c0_i32 = arith.constant 0 : i32
    %c0_i32_0 = arith.constant 0 : i32
    %c0_i32_1 = arith.constant 0 : i32
    return %c0_i32, %c0_i32_0 : i32, i32
  }
  func.func @transform_4(%arg0: i32) -> (i32, i32) {
    %c0_i32 = arith.constant 0 : i32
    %c0_i32_0 = arith.constant 0 : i32
    %c0_i32_1 = arith.constant 0 : i32
    return %c0_i32, %c0_i32_0 : i32, i32
  }
  func.func @transform_5(%arg0: i32) -> (i32, i32) {
    %c0_i32 = arith.constant 0 : i32
    %c0_i32_0 = arith.constant 0 : i32
    %c0_i32_1 = arith.constant 0 : i32
    return %c0_i32, %c0_i32_0 : i32, i32
  }
  func.func @transform_6(%arg0: i32) -> (i32, i32) {
    %c0_i32 = arith.constant 0 : i32
    %c0_i32_0 = arith.constant 0 : i32
    %c0_i32_1 = arith.constant 0 : i32
    return %c0_i32, %c0_i32_0 : i32, i32
  }
  func.func @transform_7(%arg0: i32) -> (i32, i32) {
    %c0_i32 = arith.constant 0 : i32
    %c0_i32_0 = arith.constant 0 : i32
    return %arg0, %c0_i32 : i32, i32
  }
}

</mosaic_0001>

<bundles_post_ra>
// kernel: tpu_custom_call.1
= control target key start
LH: loop header
LB: loop body
LE: loop exit
PB: predicated region body
PF: predicated region fallthrough
CT: control target
= control target key end

     0   :  { %s685_s26 = smov 0   ;;  %s748_s0 = inlined_call_operand.vmem [shape: f32[32,13], index: 0, kind: input, shape index: {}]   ;;  %s749_s1 = inlined_call_operand.vmem [shape: f32[13,64], index: 1, kind: input, shape index: {}]   ;;  %s750_s2 = inlined_call_operand.vmem [shape: f32[1,64], index: 2, kind: input, shape index: {}]   ;;  %s751_s3 = inlined_call_operand.vmem [shape: f32[64,32], index: 3, kind: input, shape index: {}]   ;;  %s752_s4 = inlined_call_operand.vmem [shape: f32[1,32], index: 4, kind: input, shape index: {}]   ;;  %s753_s5 = inlined_call_operand.vmem [shape: f32[1,32], index: 5, kind: input, shape index: {}]   ;;  %s754_s6 = inlined_call_operand.<no memory space> [shape: f32[1,1], index: 6, kind: input, shape index: {}]   ;;  %s755_s7 = inlined_call_operand.vmem [shape: f32[32,1], index: 7, kind: output, shape index: {}]  }
   0x1   :  { %v12_v0 = vstv %s754_s6 }
   0x2   :  { %13 = vst [vmem:[#allocation2] sm:$0x1] %v12_v0 }
   0x3 LB: > { %s566_s27 = sadd.s32 4294967295, %s640_s26   ;;  %p570_p0 = scmp.ge.s32.totalorder %s640_s26, 1  ;;  %s640_s26 = sphi %s685_s26, %s19_s26  }
   0x4   : > { %p240_p1 = scmp.lt.s32.totalorder %s640_s26, 3 }
   0x6   : > { %p241_p2 = pnand %p570_p0, %p240_p1 }
   0x7   : > { %s571_s8 = sshll.u32 (!%p241_p2), %s566_s27, 1 }
   0x8   : > { %244 = sbr.rel (%p241_p2) target bundleno = 566 (0x236), region = 48  ;;  %p273_p3 = scmp.lt.s32.totalorder (!%p241_p2), %s571_s8, 3 }
   0xd   : > { %v287_v1 = vld [vmem:[%s749_s1 + $0x8] sm:$0x1f]  ;;  %vm302_vm0 = vcmask 1044480   ;;  %v286_v2 = vld [vmem:[%s749_s1] sm:$0xff]  ;;  %v390_v3 = vld [vmem:[%s751_s3 + $0x38] sm:$0xff]  ;;  %s757_s8 = smov (!%p273_p3, %s571_s8), 3 }
   0xe   : > { %600 = vmatprep.subr.msk.mxu0 %vm302_vm0, %v287_v1  ;;  %v389_v4 = vld [vmem:[%s751_s3 + $0x30] sm:$0xff]  ;;  %607 = vmatprep.subr.mxu1 %v390_v3  ;;  %v388_v5 = vld [vmem:[%s751_s3 + $0x28] sm:$0xff]  ;;  %s572_s15 = sshll.u32 %s757_s8, 3  ;;  %vm295_vm1 = vcmask 105472   ;;  %v387_v6 = vld [vmem:[%s751_s3 + $0x20] sm:$0xff]  ;;  %vm398_vm2 = vcmask 523264  }
   0xf   : > { %601 = vmatpush3.msk.msra.mxu0 %vm302_vm0, %v287_v1  ;;  %608 = vmatpush3.msra.mxu1 %v390_v3  ;;  %s276_s20 = scalar_lea.vmem %s748_s0, %s572_s15  ;;  %v386_v9 = vld [vmem:[%s751_s3 + $0x18] sm:$0xff]  ;;  %v385_v10 = vld [vmem:[%s751_s3 + $0x10] sm:$0xff]  ;;  %v384_v11 = vld [vmem:[%s751_s3 + $0x8] sm:$0xff]  ;;  %vm491_vm3 = vcmask 261120   ;;  %s282_s16 = scalar_lea.vmem %s755_s7, %s572_s15  ;;  %vm507_vm4 = vcmask 7168  }
  0x10   : > { %602 = vmatprep.subr.mxu0 %v286_v2  ;;  %609 = vmatprep.subr.mxu1 %v389_v4  ;;  %v284_v7 = vld [vmem:[%s276_s20] sm:$0xff]  ;;  %v285_v8 = vld [vmem:[%s276_s20 + $0x8] sm:$0xff] }
  0x11   : > { %603 = vmatpush3.msra.mxu0 %v286_v2  ;;  %610 = vmatpush3.msra.mxu1 %v389_v4  ;;  %v383_v12 = vld [vmem:[%s751_s3] sm:$0xff] }
  0x12   : > { %611 = vmatprep.subr.mxu1 %v388_v5  ;;  %604 = vmatprep.mubr.msk.f32.mxu0 %vm295_vm1, %v284_v7  ;;  %v575_v13 = vld [vmem:[%s750_s2] ss:$0 sm:$0xff] }
  0x13   : > { %612 = vmatpush3.msra.mxu1 %v388_v5  ;;  %605 = vmatmul.mubr.msk.f32.vlgmr.msra.gmra.mxu0 %vm295_vm1, %v285_v8  ;;  %v579_v20 = vld [vmem:[%s752_s4] ss:$0 sm:$0xff] }
  0x14   : > { %613 = vmatprep.subr.mxu1 %v387_v6  ;;  %v582_v27 = vld [vmem:[%s753_s5] ss:$0 sm:$0xff] }
  0x15   : > { %614 = vmatpush3.msra.mxu1 %v387_v6  ;;  %v583_v32 = vld [vmem:[#allocation2] ss:$0 sm:$0xff] }
  0x16   : > { %615 = vmatprep.subr.mxu1 %v386_v9 }
  0x17   : > { %616 = vmatpush3.msra.mxu1 %v386_v9 }
  0x18   : > { %617 = vmatprep.subr.mxu1 %v385_v10 }
  0x19   : > { %618 = vmatpush3.msra.mxu1 %v385_v10 }
  0x1a   : > { %619 = vmatprep.subr.mxu1 %v384_v11 }
  0x1b   : > { %620 = vmatpush3.msra.mxu1 %v384_v11 }
  0x1c   : > { %621 = vmatprep.subr.mxu1 %v383_v12 }
  0x1d   : > { %622 = vmatpush3.msra.mxu1 %v383_v12 }
  0xd3   : > { %v606_v14 = vpop.f32.mrf.mxu0 }
  0xd4   : > { %v378_v15 = vadd.f32 %v606_v14, %v575_v13 }
  0xd5   : > { %v372_v16 = vpop.f32.mrf.mxu0 }
  0xd6   : > { %v373_v17 = vadd.f32 %v575_v13, %v372_v16  ;;  %v382_v19 = vmax.f32 %v378_v15, 0.0 }
  0xd8   : > { %v381_v18 = vmax.f32 %v373_v17, 0.0 }
  0xda   : > { %623 = vmatprep.mubr.msk.f32.mxu1 %vm398_vm2, %v381_v18 }
  0xdb   : > { %624 = vmatmul.mubr.msk.f32.vlgmr.msra.gmra.mxu1 %vm398_vm2, %v382_v19 }
 0x19b   : > { %v625_v21 = vpop.f32.mrf.mxu1 }
 0x19c   : > { %v477_v22 = vadd.f32 %v625_v21, %v579_v20 }
 0x19d   : > { %v471_v23 = vpop.f32.mrf.mxu1 }
 0x19e   : > { %v472_v24 = vadd.f32 %v579_v20, %v471_v23  ;;  %v481_v25 = vmax.f32 %v477_v22, 0.0 }
 0x1a0   : > { %v480_v26 = vmax.f32 %v472_v24, 0.0  ;;  %v490_v30 = vmul.f32 %v582_v27, %v481_v25 }
 0x1a2   : > { %v489_v28 = vmul.f32 %v582_v27, %v480_v26  ;;  %v495_v31 = vsel %vm491_vm3, %v490_v30, 0.0 }
 0x1a4   : > { %v492_v29 = vsel %vm491_vm3, %v489_v28, 0.0 }
 0x1a5   : > { %493 = vadd.xlane.f32.xlu0 %v492_v29 }
 0x1a9   : > { %496 = vadd.xlane.f32.xlu0 %v495_v31 }
 0x22e   : > { %v494_v33 = vpop.xlane.xlu0 %493 }
 0x22f   : > { %v505_v34 = vadd.f32 %v583_v32, %v494_v33 }
 0x231   : > { %508 = vst.msk [vmem:[%s282_s16] sm:$0xff] %vm507_vm4, %v505_v34 }
 0x232   : > { %v497_v35 = vpop.xlane.xlu0 %496 }
 0x233   : > { %v506_v36 = vadd.f32 %v583_v32, %v497_v35 }
 0x235   : > { %509 = vst.msk [vmem:[%s282_s16 + $0x8] sm:$0xff] %vm507_vm4, %v506_v36 }
 0x236 PF: > { %s19_s26 = sadd.s32 1, %s640_s26  }
 0x237   : > { %p16_p4 = scmp.ge.s32.totalorder %s19_s26, 4  }
 0x239   :  { %18 = sbr.rel (!%p16_p4) target bundleno = 3 (0x3), region = 78 }

</bundles_post_ra>
